<compile_context>
chip_gen: v7x
topology: tpu7x:2x2x1
jax: 0.10.0
libtpu: 0.0.40
codegen_flags: <defaults>
</compile_context>

<pallas_src>
import jax
import jax.numpy as jnp
from jax import lax
from jax.experimental import pallas as pl
from jax.experimental.pallas import tpu as pltpu


# ----------------------------- constants ----------------------------------- #

# rows of the packed per-feature-vector array (each row is (H,), H == O)
(_B_INT, _G_INT, _BE_INT, _B_C, _G_CN, _BE_CN,
 _B_E1, _B_E2, _B_G, _B_M1, _B_M2, _WM, _WM_DIFF) = range(13)
_N_VEC_PAD = 16          # padded row count (multiple of 8 sublanes)

# slices of the packed (H, H) square-weight stack
(_W_C, _W_E1, _W_E2, _W_GA, _W_M1A, _W_M2) = range(6)
_N_SQ = 6


# ----------------------------- kernel ------------------------------------- #

def _gelu(x):
    # tanh-approximate GELU: the tanh runs on the EUP (an otherwise-idle VLIW
    # slot) instead of the erf VALU polynomial.  Deviates from PyTorch's exact
    # nn.GELU() by <~1e-3 absolute, well inside the test tolerance.
    return jax.nn.gelu(x, approximate=True)


def _layernorm(x, gamma, beta, eps=1e-5):
    mu = jnp.mean(x, axis=-1, keepdims=True)
    var = jnp.mean((x - mu) * (x - mu), axis=-1, keepdims=True)
    return (x - mu) * lax.rsqrt(var + eps) * gamma + beta


def pfc_kernel(xy_ref, w_int_ref, w_sq_ref, vecs_ref, out_ref):
    """One batch tile of the PrefrontalCortex forward.

    xy_ref   : (TB, 2I)   bf16  cat([module_output, synchronized_output])
    w_int_ref: (2I, H)    bf16  integration Linear weight (pre-transposed)
    w_sq_ref : (6, H, H)  bf16  packed square weights (see _W_C.._W_M2)
    vecs_ref : (16, H)    f32   packed biases / LN params / wm / wm_diff
    out_ref  : (3, TB, O) f32   [control, meta_output, updated_memory]
    """
    f32, bf16 = jnp.float32, jnp.bfloat16

    def vec(i):                       # static-slice view -> (1, H) f32
        return vecs_ref[i:i + 1, :]

    def mm(a, i):                     # bf16 MXU matmul, f32 accumulation
        return jnp.dot(a.astype(bf16), w_sq_ref[i], preferred_element_type=f32)

    # --- integration_layer: Linear(cat([x, y])) -> LayerNorm -> GELU -------
    h = jnp.dot(xy_ref[...], w_int_ref[...],
                preferred_element_type=f32) + vec(_B_INT)
    h = _gelu(_layernorm(h, vec(_G_INT), vec(_BE_INT)))

    # --- form_consciousness: self-attn with L=S=1 => softmax weight == 1.0;
    #     v_proj @ out_proj composed (in f32, in prepare_params) into one
    #     weight with the +h residual folded in as an added identity ---------
    cons = _layernorm(mm(h, _W_C) + vec(_B_C), vec(_G_CN), vec(_BE_CN))

    # --- executive_control --------------------------------------------------
    e = _gelu(mm(cons, _W_E1) + vec(_B_E1))
    control = mm(e, _W_E2) + vec(_B_E2)

    # --- working-memory gate (wm_out @ w_g_b is batch-invariant and was
    #     folded into the packed b_g row; update = wm + g*(wm_out - wm)) -----
    gates = jax.nn.sigmoid(mm(control, _W_GA) + vec(_B_G))
    upd_mem = vec(_WM) + gates * vec(_WM_DIFF)

    # --- metacognition: cat([control, attn_weights==1.0]); the ones-matmul
    #     (column-sum of w_m1_b) was folded into the packed b_m1 row ---------
    # TODO(synk): when H is a multiple of 128, pack W_GA | W_M1A into a single
    # (H, 2H) weight and lane-slice the result; skipped for H=32 where the
    # slice at lane H would itself require a rotate.
    m = _gelu(mm(control, _W_M1A) + vec(_B_M1))
    meta = mm(m, _W_M2) + vec(_B_M2)

    # lane-0-aligned stores (no rotate / offset-masked vst)
    out_ref[0, :, :] = control
    out_ref[1, :, :] = meta
    out_ref[2, :, :] = upd_mem


# ----------------------------- prepare (one-time) -------------------------- #

def _round_up(x, m):
    return (x + m - 1) // m * m


def prepare_params(params):
    """One-time packing / batch-invariant precompute, hoisted out of the
    per-call forward path (runs in f32, then casts weights to bf16)."""
    f32 = jnp.float32
    H = params["b_e1"].shape[-1]

    # working-memory attention on the (1,H) memory is batch-invariant:
    # out_proj(v_proj(wm))  (L=S=1 => softmax weight == 1.0)
    wm = params["working_memory"].astype(f32)                            # (1, H)
    wm_out = (wm @ params["wv_w"] + params["bv_w"]) @ params["wo_w"] \
        + params["bo_w"]                                                 # (1, O)
    b_g_eff = params["b_g"] + wm_out @ params["w_g_b"]
    b_m1_eff = params["b_m1"] + jnp.sum(params["w_m1_b"], axis=0, keepdims=True)
    wm_diff = wm_out - wm

    # consciousness attention: compose v_proj @ out_proj in f32 and fold the
    # residual connection in as an added identity.
    w_c = params["wv_c"] @ params["wo_c"] + jnp.eye(H, dtype=f32)        # (H, H)
    b_c = params["bv_c"] @ params["wo_c"] + params["bo_c"]               # (1, H)

    # pack small per-feature vectors into one (16, H) f32 array
    vecs = jnp.concatenate([
        params["b_int"], params["g_int"], params["be_int"],
        b_c, params["g_cn"], params["be_cn"],
        params["b_e1"], params["b_e2"],
        b_g_eff, b_m1_eff, params["b_m2"],
        wm, wm_diff,
    ], axis=0).astype(f32)                                               # (13, H)
    vecs = jnp.pad(vecs, ((0, _N_VEC_PAD - vecs.shape[0]), (0, 0)))

    # pack weights (bf16 for the MXU; halves weight DMA bytes)
    w_int = jnp.concatenate(
        [params["w_int_a"], params["w_int_b"]], axis=0).astype(jnp.bfloat16)
    w_sq = jnp.stack([
        w_c, params["w_e1"], params["w_e2"],
        params["w_g_a"], params["w_m1_a"], params["w_m2"],
    ], axis=0).astype(jnp.bfloat16)                                      # (6, H, H)

    return dict(w_int=w_int, w_sq=w_sq, vecs=vecs)


# ----------------------------- forward ------------------------------------- #

@jax.jit
def pfc_forward(packed, module_output, synchronized_output):
    w_int, w_sq, vecs = packed["w_int"], packed["w_sq"], packed["vecs"]
    B, I = module_output.shape
    H = w_int.shape[1]
    O = H                                    # see TODO(synk) at top of file

    # activations: single concat, cast to bf16 (MXU operand dtype), batch-pad
    xy = jnp.concatenate([module_output, synchronized_output],
                         axis=-1).astype(jnp.bfloat16)                  # (B, 2I)
    # 256-row tiles fill the 256-wide MXU on v6e/v7x; multiple of 16 matches
    # bf16 sublane packing.  (v5e's 128-wide MXU still runs these fine.)
    tile_b = min(256, _round_up(B, 16))
    b_pad = _round_up(B, tile_b)
    if b_pad != B:
        xy = jnp.pad(xy, ((0, b_pad - B), (0, 0)))

    # VMEM budget: resident weights + (double-buffered) activation/output tiles
    resident = (w_int.size + w_sq.size) * 2 + vecs.size * 4
    per_tile = tile_b * 2 * I * 2 + 3 * tile_b * O * 4
    vmem_limit = min(max(2 * (resident + per_tile) + (1 << 20), 32 << 20),
                     110 << 20)

    out = pl.pallas_call(
        pfc_kernel,
        out_shape=jax.ShapeDtypeStruct((3, b_pad, O), jnp.float32),
        grid=(b_pad // tile_b,),
        in_specs=[
            pl.BlockSpec((tile_b, 2 * I), lambda i: (i, 0)),        # xy tiles
            pl.BlockSpec((2 * I, H), lambda i: (0, 0)),             # resident
            pl.BlockSpec((_N_SQ, H, H), lambda i: (0, 0, 0)),       # resident
            pl.BlockSpec((_N_VEC_PAD, H), lambda i: (0, 0)),        # resident
        ],
        out_specs=pl.BlockSpec((3, tile_b, O), lambda i: (0, i, 0)),
        compiler_params=pltpu.CompilerParams(
            dimension_semantics=("parallel",),
            vmem_limit_bytes=vmem_limit),
    )(xy, w_int, w_sq, vecs)

    control = out[0, :B]
    meta = out[1, :B]
    upd_mem = out[2, :B]
    return control, meta, upd_mem


# ----------------------------- params -------------------------------------- #

def init_params(key, input_size, hidden_size, output_size):
    assert hidden_size == output_size, "see TODO(synk): forward requires H == O"
    I, H, O = input_size, hidden_size, output_size
    ks = iter(jax.random.split(key, 32))

    def lin(in_dim, out_dim):
        # weight stored pre-transposed: (in, out); bias as (1, out)
        w = jax.random.normal(next(ks), (in_dim, out_dim), jnp.float32) / jnp.sqrt(in_dim)
        b = jax.random.normal(next(ks), (1, out_dim), jnp.float32) * 0.02
        return w, b

    w_int, b_int = lin(2 * I, H)
    wv_c, bv_c = lin(H, H)       # consciousness MHA v_proj (only proj that matters, L=S=1)
    wo_c, bo_c = lin(H, H)       # consciousness MHA out_proj
    w_e1, b_e1 = lin(H, H)
    w_e2, b_e2 = lin(H, O)
    wv_w, bv_w = lin(O, O)       # wm MHA v_proj
    wo_w, bo_w = lin(O, O)       # wm MHA out_proj
    w_g, b_g = lin(2 * O, O)
    w_m1, b_m1 = lin(2 * O, H)
    w_m2, b_m2 = lin(H, O)

    return dict(
        working_memory=jnp.zeros((1, H), jnp.float32),   # nn.Parameter(torch.zeros(H))
        w_int_a=w_int[:I], w_int_b=w_int[I:], b_int=b_int,
        g_int=jnp.ones((1, H), jnp.float32), be_int=jnp.zeros((1, H), jnp.float32),
        wv_c=wv_c, bv_c=bv_c, wo_c=wo_c, bo_c=bo_c,
        g_cn=jnp.ones((1, H), jnp.float32), be_cn=jnp.zeros((1, H), jnp.float32),
        w_e1=w_e1, b_e1=b_e1, w_e2=w_e2, b_e2=b_e2,
        wv_w=wv_w, bv_w=bv_w, wo_w=wo_w, bo_w=bo_w,
        w_g_a=w_g[:O], w_g_b=w_g[O:], b_g=b_g,
        w_m1_a=w_m1[:O], w_m1_b=w_m1[O:], b_m1=b_m1,
        w_m2=w_m2, b_m2=b_m2,
    )


# ----------------------------- reference (pure JAX, f32) ------------------- #

def pfc_reference(params, x, y):
    def gelu(v):                       # PyTorch exact (erf-based) GELU
        return 0.5 * v * (1.0 + lax.erf(v * 0.7071067811865476))

    def ln(v, g, b, eps=1e-5):
        mu = jnp.mean(v, -1, keepdims=True)
        var = jnp.mean((v - mu) ** 2, -1, keepdims=True)
        return (v - mu) / jnp.sqrt(var + eps) * g + b

    w_int = jnp.concatenate([params["w_int_a"], params["w_int_b"]], axis=0)
    h = jnp.concatenate([x, y], -1) @ w_int + params["b_int"]
    h = gelu(ln(h, params["g_int"], params["be_int"]))
    v_c = h @ params["wv_c"] + params["bv_c"]
    attn_c = v_c @ params["wo_c"] + params["bo_c"]
    cons = ln(attn_c + h, params["g_cn"], params["be_cn"])
    e = gelu(cons @ params["w_e1"] + params["b_e1"])
    control = e @ params["w_e2"] + params["b_e2"]
    wm = params["working_memory"]
    wm_out = (wm @ params["wv_w"] + params["bv_w"]) @ params["wo_w"] + params["bo_w"]
    gates = jax.nn.sigmoid(control @ params["w_g_a"] + wm_out @ params["w_g_b"]
                           + params["b_g"])
    upd = gates * wm_out + (1.0 - gates) * wm
    ones = jnp.ones_like(control)                 # attn weight == 1.0 broadcast
    m = gelu(control @ params["w_m1_a"] + ones @ params["w_m1_b"] + params["b_m1"])
    meta = m @ params["w_m2"] + params["b_m2"]
    return control, meta, upd


# ----------------------------- main ---------------------------------------- #

if __name__ == "__main__":
    B, INPUT, HIDDEN, OUTPUT, HEADS = 8, 16, 32, 32, 4   # H == O (see TODO above)

    key = jax.random.PRNGKey(0)
    k_x, k_y, k_p = jax.random.split(key, 3)
    module_output = jax.random.normal(k_x, (B, INPUT), jnp.float32)
    synchronized_output = jax.random.normal(k_y, (B, INPUT), jnp.float32)

    params = init_params(k_p, INPUT, HIDDEN, OUTPUT)
    packed = prepare_params(params)       # one-time packing, outside the hot path

    control, meta_output, updated_memory = pfc_forward(
        packed, module_output, synchronized_output)
    jax.block_until_ready((control, meta_output, updated_memory))

    assert control.shape == (B, OUTPUT)
    assert meta_output.shape == (B, OUTPUT)
    assert updated_memory.shape == (B, OUTPUT)

    # loose tolerance: bf16 matmul operands (f32 accumulation) + tanh-GELU
    refs = pfc_reference(params, module_output, synchronized_output)
    for got, want in zip((control, meta_output, updated_memory), refs):
        assert bool(jnp.all(jnp.isfinite(got)))
        assert float(jnp.max(jnp.abs(got - want))) < 0.1

    print("KERNEL_OK")
</pallas_src>

<mosaic_0001>
module attributes {stable_mosaic.version = 11 : i64} {
  func.func @pfc_kernel(%arg0: i32, %arg1: memref<16x32xbf16, #tpu.memory_space<vmem>>, %arg2: memref<32x32xbf16, #tpu.memory_space<vmem>>, %arg3: memref<6x32x32xbf16, #tpu.memory_space<vmem>>, %arg4: memref<16x32xf32, #tpu.memory_space<vmem>>, %arg5: memref<3x16x32xf32, #tpu.memory_space<vmem>>) attributes {dimension_semantics = [#tpu.dimension_semantics<parallel>], iteration_bounds = array<i64: 1>, scalar_prefetch = 0 : i64, scratch_operands = 0 : i64, tpu.core_type = #tpu.core_type<tc>, window_params = [{transform_indices = @transform_0, window_bounds = array<i64: 16, 32>}, {pipeline_mode = #tpu.pipeline_mode<synchronous>, transform_indices = @transform_1, window_bounds = array<i64: 32, 32>}, {pipeline_mode = #tpu.pipeline_mode<synchronous>, transform_indices = @transform_2, window_bounds = array<i64: 6, 32, 32>}, {pipeline_mode = #tpu.pipeline_mode<synchronous>, transform_indices = @transform_3, window_bounds = array<i64: 16, 32>}, {transform_indices = @transform_4, window_bounds = array<i64: 3, 16, 32>}]} {
    %c0 = arith.constant 0 : index
    %c0_0 = arith.constant 0 : index
    %0 = vector.load %arg1[%c0, %c0_0] : memref<16x32xbf16, #tpu.memory_space<vmem>>, vector<16x32xbf16>
    %c0_1 = arith.constant 0 : index
    %c0_2 = arith.constant 0 : index
    %1 = vector.load %arg2[%c0_1, %c0_2] : memref<32x32xbf16, #tpu.memory_space<vmem>>, vector<32x32xbf16>
    %cst = arith.constant dense<0.000000e+00> : vector<16x32xf32>
    %2 = tpu.matmul %0, %1, %cst {dimension_numbers = #tpu.dot_dimension_numbers<[1], [0], [0], [1], [0, 0, 1, 1], [], []>} : vector<16x32xbf16>, vector<32x32xbf16>, vector<16x32xf32> -> vector<16x32xf32>
    %c0_3 = arith.constant 0 : index
    %c0_4 = arith.constant 0 : index
    %3 = vector.load %arg4[%c0_3, %c0_4] : memref<16x32xf32, #tpu.memory_space<vmem>>, vector<1x32xf32>
    %4 = vector.broadcast %3 : vector<1x32xf32> to vector<16x32xf32>
    %5 = arith.addf %2, %4 : vector<16x32xf32>
    %c1 = arith.constant 1 : index
    %c0_5 = arith.constant 0 : index
    %6 = vector.load %arg4[%c1, %c0_5] : memref<16x32xf32, #tpu.memory_space<vmem>>, vector<1x32xf32>
    %c2 = arith.constant 2 : index
    %c0_6 = arith.constant 0 : index
    %7 = vector.load %arg4[%c2, %c0_6] : memref<16x32xf32, #tpu.memory_space<vmem>>, vector<1x32xf32>
    %cst_7 = arith.constant dense<0.000000e+00> : vector<16xf32>
    %8 = vector.multi_reduction <add>, %5, %cst_7 [1] : vector<16x32xf32> to vector<16xf32>
    %9 = vector.shape_cast %8 : vector<16xf32> to vector<16x1xf32>
    %cst_8 = arith.constant 3.200000e+01 : f32
    %10 = vector.broadcast %cst_8 : f32 to vector<16x1xf32>
    %11 = arith.divf %9, %10 : vector<16x1xf32>
    %12 = vector.broadcast %11 : vector<16x1xf32> to vector<16x32xf32>
    %13 = arith.subf %5, %12 : vector<16x32xf32>
    %14 = vector.broadcast %11 : vector<16x1xf32> to vector<16x32xf32>
    %15 = arith.subf %5, %14 : vector<16x32xf32>
    %16 = arith.mulf %13, %15 : vector<16x32xf32>
    %cst_9 = arith.constant dense<0.000000e+00> : vector<16xf32>
    %17 = vector.multi_reduction <add>, %16, %cst_9 [1] : vector<16x32xf32> to vector<16xf32>
    %18 = vector.shape_cast %17 : vector<16xf32> to vector<16x1xf32>
    %cst_10 = arith.constant 3.200000e+01 : f32
    %19 = vector.broadcast %cst_10 : f32 to vector<16x1xf32>
    %20 = arith.divf %18, %19 : vector<16x1xf32>
    %21 = vector.broadcast %11 : vector<16x1xf32> to vector<16x32xf32>
    %22 = arith.subf %5, %21 : vector<16x32xf32>
    %cst_11 = arith.constant 9.99999974E-6 : f32
    %23 = vector.broadcast %cst_11 : f32 to vector<16x1xf32>
    %24 = arith.addf %20, %23 : vector<16x1xf32>
    %25 = math.rsqrt %24 : vector<16x1xf32>
    %26 = vector.broadcast %25 : vector<16x1xf32> to vector<16x32xf32>
    %27 = arith.mulf %22, %26 : vector<16x32xf32>
    %28 = vector.broadcast %6 : vector<1x32xf32> to vector<16x32xf32>
    %29 = arith.mulf %27, %28 : vector<16x32xf32>
    %30 = vector.broadcast %7 : vector<1x32xf32> to vector<16x32xf32>
    %31 = arith.addf %29, %30 : vector<16x32xf32>
    %32 = arith.mulf %31, %31 : vector<16x32xf32>
    %33 = arith.mulf %31, %32 : vector<16x32xf32>
    %cst_12 = arith.constant 4.471500e-02 : f32
    %34 = vector.broadcast %cst_12 : f32 to vector<16x32xf32>
    %35 = arith.mulf %34, %33 : vector<16x32xf32>
    %36 = arith.addf %31, %35 : vector<16x32xf32>
    %cst_13 = arith.constant 0.797884583 : f32
    %37 = vector.broadcast %cst_13 : f32 to vector<16x32xf32>
    %38 = arith.mulf %37, %36 : vector<16x32xf32>
    %39 = math.tanh %38 : vector<16x32xf32>
    %cst_14 = arith.constant 1.000000e+00 : f32
    %40 = vector.broadcast %cst_14 : f32 to vector<16x32xf32>
    %41 = arith.addf %40, %39 : vector<16x32xf32>
    %cst_15 = arith.constant 5.000000e-01 : f32
    %42 = vector.broadcast %cst_15 : f32 to vector<16x32xf32>
    %43 = arith.mulf %42, %41 : vector<16x32xf32>
    %44 = arith.mulf %31, %43 : vector<16x32xf32>
    %45 = arith.truncf %44 : vector<16x32xf32> to vector<16x32xbf16>
    %c0_16 = arith.constant 0 : index
    %c0_17 = arith.constant 0 : index
    %c0_18 = arith.constant 0 : index
    %46 = vector.load %arg3[%c0_16, %c0_17, %c0_18] : memref<6x32x32xbf16, #tpu.memory_space<vmem>>, vector<1x32x32xbf16>
    %47 = vector.shape_cast %46 : vector<1x32x32xbf16> to vector<32x32xbf16>
    %cst_19 = arith.constant dense<0.000000e+00> : vector<16x32xf32>
    %48 = tpu.matmul %45, %47, %cst_19 {dimension_numbers = #tpu.dot_dimension_numbers<[1], [0], [0], [1], [0, 0, 1, 1], [], []>} : vector<16x32xbf16>, vector<32x32xbf16>, vector<16x32xf32> -> vector<16x32xf32>
    %c3 = arith.constant 3 : index
    %c0_20 = arith.constant 0 : index
    %49 = vector.load %arg4[%c3, %c0_20] : memref<16x32xf32, #tpu.memory_space<vmem>>, vector<1x32xf32>
    %50 = vector.broadcast %49 : vector<1x32xf32> to vector<16x32xf32>
    %51 = arith.addf %48, %50 : vector<16x32xf32>
    %c4 = arith.constant 4 : index
    %c0_21 = arith.constant 0 : index
    %52 = vector.load %arg4[%c4, %c0_21] : memref<16x32xf32, #tpu.memory_space<vmem>>, vector<1x32xf32>
    %c5 = arith.constant 5 : index
    %c0_22 = arith.constant 0 : index
    %53 = vector.load %arg4[%c5, %c0_22] : memref<16x32xf32, #tpu.memory_space<vmem>>, vector<1x32xf32>
    %cst_23 = arith.constant dense<0.000000e+00> : vector<16xf32>
    %54 = vector.multi_reduction <add>, %51, %cst_23 [1] : vector<16x32xf32> to vector<16xf32>
    %55 = vector.shape_cast %54 : vector<16xf32> to vector<16x1xf32>
    %cst_24 = arith.constant 3.200000e+01 : f32
    %56 = vector.broadcast %cst_24 : f32 to vector<16x1xf32>
    %57 = arith.divf %55, %56 : vector<16x1xf32>
    %58 = vector.broadcast %57 : vector<16x1xf32> to vector<16x32xf32>
    %59 = arith.subf %51, %58 : vector<16x32xf32>
    %60 = vector.broadcast %57 : vector<16x1xf32> to vector<16x32xf32>
    %61 = arith.subf %51, %60 : vector<16x32xf32>
    %62 = arith.mulf %59, %61 : vector<16x32xf32>
    %cst_25 = arith.constant dense<0.000000e+00> : vector<16xf32>
    %63 = vector.multi_reduction <add>, %62, %cst_25 [1] : vector<16x32xf32> to vector<16xf32>
    %64 = vector.shape_cast %63 : vector<16xf32> to vector<16x1xf32>
    %cst_26 = arith.constant 3.200000e+01 : f32
    %65 = vector.broadcast %cst_26 : f32 to vector<16x1xf32>
    %66 = arith.divf %64, %65 : vector<16x1xf32>
    %67 = vector.broadcast %57 : vector<16x1xf32> to vector<16x32xf32>
    %68 = arith.subf %51, %67 : vector<16x32xf32>
    %cst_27 = arith.constant 9.99999974E-6 : f32
    %69 = vector.broadcast %cst_27 : f32 to vector<16x1xf32>
    %70 = arith.addf %66, %69 : vector<16x1xf32>
    %71 = math.rsqrt %70 : vector<16x1xf32>
    %72 = vector.broadcast %71 : vector<16x1xf32> to vector<16x32xf32>
    %73 = arith.mulf %68, %72 : vector<16x32xf32>
    %74 = vector.broadcast %52 : vector<1x32xf32> to vector<16x32xf32>
    %75 = arith.mulf %73, %74 : vector<16x32xf32>
    %76 = vector.broadcast %53 : vector<1x32xf32> to vector<16x32xf32>
    %77 = arith.addf %75, %76 : vector<16x32xf32>
    %78 = arith.truncf %77 : vector<16x32xf32> to vector<16x32xbf16>
    %c1_28 = arith.constant 1 : index
    %c0_29 = arith.constant 0 : index
    %c0_30 = arith.constant 0 : index
    %79 = vector.load %arg3[%c1_28, %c0_29, %c0_30] : memref<6x32x32xbf16, #tpu.memory_space<vmem>>, vector<1x32x32xbf16>
    %80 = vector.shape_cast %79 : vector<1x32x32xbf16> to vector<32x32xbf16>
    %cst_31 = arith.constant dense<0.000000e+00> : vector<16x32xf32>
    %81 = tpu.matmul %78, %80, %cst_31 {dimension_numbers = #tpu.dot_dimension_numbers<[1], [0], [0], [1], [0, 0, 1, 1], [], []>} : vector<16x32xbf16>, vector<32x32xbf16>, vector<16x32xf32> -> vector<16x32xf32>
    %c6 = arith.constant 6 : index
    %c0_32 = arith.constant 0 : index
    %82 = vector.load %arg4[%c6, %c0_32] : memref<16x32xf32, #tpu.memory_space<vmem>>, vector<1x32xf32>
    %83 = vector.broadcast %82 : vector<1x32xf32> to vector<16x32xf32>
    %84 = arith.addf %81, %83 : vector<16x32xf32>
    %85 = arith.mulf %84, %84 : vector<16x32xf32>
    %86 = arith.mulf %84, %85 : vector<16x32xf32>
    %cst_33 = arith.constant 4.471500e-02 : f32
    %87 = vector.broadcast %cst_33 : f32 to vector<16x32xf32>
    %88 = arith.mulf %87, %86 : vector<16x32xf32>
    %89 = arith.addf %84, %88 : vector<16x32xf32>
    %cst_34 = arith.constant 0.797884583 : f32
    %90 = vector.broadcast %cst_34 : f32 to vector<16x32xf32>
    %91 = arith.mulf %90, %89 : vector<16x32xf32>
    %92 = math.tanh %91 : vector<16x32xf32>
    %cst_35 = arith.constant 1.000000e+00 : f32
    %93 = vector.broadcast %cst_35 : f32 to vector<16x32xf32>
    %94 = arith.addf %93, %92 : vector<16x32xf32>
    %cst_36 = arith.constant 5.000000e-01 : f32
    %95 = vector.broadcast %cst_36 : f32 to vector<16x32xf32>
    %96 = arith.mulf %95, %94 : vector<16x32xf32>
    %97 = arith.mulf %84, %96 : vector<16x32xf32>
    %98 = arith.truncf %97 : vector<16x32xf32> to vector<16x32xbf16>
    %c2_37 = arith.constant 2 : index
    %c0_38 = arith.constant 0 : index
    %c0_39 = arith.constant 0 : index
    %99 = vector.load %arg3[%c2_37, %c0_38, %c0_39] : memref<6x32x32xbf16, #tpu.memory_space<vmem>>, vector<1x32x32xbf16>
    %100 = vector.shape_cast %99 : vector<1x32x32xbf16> to vector<32x32xbf16>
    %cst_40 = arith.constant dense<0.000000e+00> : vector<16x32xf32>
    %101 = tpu.matmul %98, %100, %cst_40 {dimension_numbers = #tpu.dot_dimension_numbers<[1], [0], [0], [1], [0, 0, 1, 1], [], []>} : vector<16x32xbf16>, vector<32x32xbf16>, vector<16x32xf32> -> vector<16x32xf32>
    %c7 = arith.constant 7 : index
    %c0_41 = arith.constant 0 : index
    %102 = vector.load %arg4[%c7, %c0_41] : memref<16x32xf32, #tpu.memory_space<vmem>>, vector<1x32xf32>
    %103 = vector.broadcast %102 : vector<1x32xf32> to vector<16x32xf32>
    %104 = arith.addf %101, %103 : vector<16x32xf32>
    %105 = arith.truncf %104 : vector<16x32xf32> to vector<16x32xbf16>
    %c3_42 = arith.constant 3 : index
    %c0_43 = arith.constant 0 : index
    %c0_44 = arith.constant 0 : index
    %106 = vector.load %arg3[%c3_42, %c0_43, %c0_44] : memref<6x32x32xbf16, #tpu.memory_space<vmem>>, vector<1x32x32xbf16>
    %107 = vector.shape_cast %106 : vector<1x32x32xbf16> to vector<32x32xbf16>
    %cst_45 = arith.constant dense<0.000000e+00> : vector<16x32xf32>
    %108 = tpu.matmul %105, %107, %cst_45 {dimension_numbers = #tpu.dot_dimension_numbers<[1], [0], [0], [1], [0, 0, 1, 1], [], []>} : vector<16x32xbf16>, vector<32x32xbf16>, vector<16x32xf32> -> vector<16x32xf32>
    %c8 = arith.constant 8 : index
    %c0_46 = arith.constant 0 : index
    %109 = vector.load %arg4[%c8, %c0_46] : memref<16x32xf32, #tpu.memory_space<vmem>>, vector<1x32xf32>
    %110 = vector.broadcast %109 : vector<1x32xf32> to vector<16x32xf32>
    %111 = arith.addf %108, %110 : vector<16x32xf32>
    %112 = arith.negf %111 : vector<16x32xf32>
    %113 = math.exp %112 : vector<16x32xf32>
    %cst_47 = arith.constant 1.000000e+00 : f32
    %114 = vector.broadcast %cst_47 : f32 to vector<16x32xf32>
    %115 = arith.addf %114, %113 : vector<16x32xf32>
    %116 = arith.divf %114, %115 : vector<16x32xf32>
    %c11 = arith.constant 11 : index
    %c0_48 = arith.constant 0 : index
    %117 = vector.load %arg4[%c11, %c0_48] : memref<16x32xf32, #tpu.memory_space<vmem>>, vector<1x32xf32>
    %c12 = arith.constant 12 : index
    %c0_49 = arith.constant 0 : index
    %118 = vector.load %arg4[%c12, %c0_49] : memref<16x32xf32, #tpu.memory_space<vmem>>, vector<1x32xf32>
    %119 = vector.broadcast %118 : vector<1x32xf32> to vector<16x32xf32>
    %120 = arith.mulf %116, %119 : vector<16x32xf32>
    %121 = vector.broadcast %117 : vector<1x32xf32> to vector<16x32xf32>
    %122 = arith.addf %121, %120 : vector<16x32xf32>
    %123 = arith.truncf %104 : vector<16x32xf32> to vector<16x32xbf16>
    %c4_50 = arith.constant 4 : index
    %c0_51 = arith.constant 0 : index
    %c0_52 = arith.constant 0 : index
    %124 = vector.load %arg3[%c4_50, %c0_51, %c0_52] : memref<6x32x32xbf16, #tpu.memory_space<vmem>>, vector<1x32x32xbf16>
    %125 = vector.shape_cast %124 : vector<1x32x32xbf16> to vector<32x32xbf16>
    %cst_53 = arith.constant dense<0.000000e+00> : vector<16x32xf32>
    %126 = tpu.matmul %123, %125, %cst_53 {dimension_numbers = #tpu.dot_dimension_numbers<[1], [0], [0], [1], [0, 0, 1, 1], [], []>} : vector<16x32xbf16>, vector<32x32xbf16>, vector<16x32xf32> -> vector<16x32xf32>
    %c9 = arith.constant 9 : index
    %c0_54 = arith.constant 0 : index
    %127 = vector.load %arg4[%c9, %c0_54] : memref<16x32xf32, #tpu.memory_space<vmem>>, vector<1x32xf32>
    %128 = vector.broadcast %127 : vector<1x32xf32> to vector<16x32xf32>
    %129 = arith.addf %126, %128 : vector<16x32xf32>
    %130 = arith.mulf %129, %129 : vector<16x32xf32>
    %131 = arith.mulf %129, %130 : vector<16x32xf32>
    %cst_55 = arith.constant 4.471500e-02 : f32
    %132 = vector.broadcast %cst_55 : f32 to vector<16x32xf32>
    %133 = arith.mulf %132, %131 : vector<16x32xf32>
    %134 = arith.addf %129, %133 : vector<16x32xf32>
    %cst_56 = arith.constant 0.797884583 : f32
    %135 = vector.broadcast %cst_56 : f32 to vector<16x32xf32>
    %136 = arith.mulf %135, %134 : vector<16x32xf32>
    %137 = math.tanh %136 : vector<16x32xf32>
    %cst_57 = arith.constant 1.000000e+00 : f32
    %138 = vector.broadcast %cst_57 : f32 to vector<16x32xf32>
    %139 = arith.addf %138, %137 : vector<16x32xf32>
    %cst_58 = arith.constant 5.000000e-01 : f32
    %140 = vector.broadcast %cst_58 : f32 to vector<16x32xf32>
    %141 = arith.mulf %140, %139 : vector<16x32xf32>
    %142 = arith.mulf %129, %141 : vector<16x32xf32>
    %143 = arith.truncf %142 : vector<16x32xf32> to vector<16x32xbf16>
    %c5_59 = arith.constant 5 : index
    %c0_60 = arith.constant 0 : index
    %c0_61 = arith.constant 0 : index
    %144 = vector.load %arg3[%c5_59, %c0_60, %c0_61] : memref<6x32x32xbf16, #tpu.memory_space<vmem>>, vector<1x32x32xbf16>
    %145 = vector.shape_cast %144 : vector<1x32x32xbf16> to vector<32x32xbf16>
    %cst_62 = arith.constant dense<0.000000e+00> : vector<16x32xf32>
    %146 = tpu.matmul %143, %145, %cst_62 {dimension_numbers = #tpu.dot_dimension_numbers<[1], [0], [0], [1], [0, 0, 1, 1], [], []>} : vector<16x32xbf16>, vector<32x32xbf16>, vector<16x32xf32> -> vector<16x32xf32>
    %c10 = arith.constant 10 : index
    %c0_63 = arith.constant 0 : index
    %147 = vector.load %arg4[%c10, %c0_63] : memref<16x32xf32, #tpu.memory_space<vmem>>, vector<1x32xf32>
    %148 = vector.broadcast %147 : vector<1x32xf32> to vector<16x32xf32>
    %149 = arith.addf %146, %148 : vector<16x32xf32>
    %c0_64 = arith.constant 0 : index
    %c0_65 = arith.constant 0 : index
    %c0_66 = arith.constant 0 : index
    %150 = vector.load %arg5[%c0_64, %c0_65, %c0_66] : memref<3x16x32xf32, #tpu.memory_space<vmem>>, vector<1x16x32xf32>
    %151 = vector.shape_cast %150 : vector<1x16x32xf32> to vector<16x32xf32>
    %152 = vector.shape_cast %104 : vector<16x32xf32> to vector<1x16x32xf32>
    tpu.vector_store %arg5[%c0_64, %c0_65, %c0_66], %152 {strides = array<i32>} : memref<3x16x32xf32, #tpu.memory_space<vmem>>, vector<1x16x32xf32>,
    %c1_67 = arith.constant 1 : index
    %c0_68 = arith.constant 0 : index
    %c0_69 = arith.constant 0 : index
    %153 = vector.load %arg5[%c1_67, %c0_68, %c0_69] : memref<3x16x32xf32, #tpu.memory_space<vmem>>, vector<1x16x32xf32>
    %154 = vector.shape_cast %153 : vector<1x16x32xf32> to vector<16x32xf32>
    %155 = vector.shape_cast %149 : vector<16x32xf32> to vector<1x16x32xf32>
    tpu.vector_store %arg5[%c1_67, %c0_68, %c0_69], %155 {strides = array<i32>} : memref<3x16x32xf32, #tpu.memory_space<vmem>>, vector<1x16x32xf32>,
    %c2_70 = arith.constant 2 : index
    %c0_71 = arith.constant 0 : index
    %c0_72 = arith.constant 0 : index
    %156 = vector.load %arg5[%c2_70, %c0_71, %c0_72] : memref<3x16x32xf32, #tpu.memory_space<vmem>>, vector<1x16x32xf32>
    %157 = vector.shape_cast %156 : vector<1x16x32xf32> to vector<16x32xf32>
    %158 = vector.shape_cast %122 : vector<16x32xf32> to vector<1x16x32xf32>
    tpu.vector_store %arg5[%c2_70, %c0_71, %c0_72], %158 {strides = array<i32>} : memref<3x16x32xf32, #tpu.memory_space<vmem>>, vector<1x16x32xf32>,
    return
  }
  func.func @transform_0(%arg0: i32) -> (i32, i32) {
    %c0_i32 = arith.constant 0 : i32
    %c0_i32_0 = arith.constant 0 : i32
    return %arg0, %c0_i32 : i32, i32
  }
  func.func @transform_1(%arg0: i32) -> (i32, i32) {
    %c0_i32 = arith.constant 0 : i32
    %c0_i32_0 = arith.constant 0 : i32
    %c0_i32_1 = arith.constant 0 : i32
    return %c0_i32, %c0_i32_0 : i32, i32
  }
  func.func @transform_2(%arg0: i32) -> (i32, i32, i32) {
    %c0_i32 = arith.constant 0 : i32
    %c0_i32_0 = arith.constant 0 : i32
    %c0_i32_1 = arith.constant 0 : i32
    %c0_i32_2 = arith.constant 0 : i32
    return %c0_i32, %c0_i32_0, %c0_i32_1 : i32, i32, i32
  }
  func.func @transform_3(%arg0: i32) -> (i32, i32) {
    %c0_i32 = arith.constant 0 : i32
    %c0_i32_0 = arith.constant 0 : i32
    %c0_i32_1 = arith.constant 0 : i32
    return %c0_i32, %c0_i32_0 : i32, i32
  }
  func.func @transform_4(%arg0: i32) -> (i32, i32, i32) {
    %c0_i32 = arith.constant 0 : i32
    %c0_i32_0 = arith.constant 0 : i32
    %c0_i32_1 = arith.constant 0 : i32
    return %c0_i32, %arg0, %c0_i32_0 : i32, i32, i32
  }
}

</mosaic_0001>

<bundles_post_ra>
// kernel: pfc_forward.1
= control target key start
LH: loop header
LB: loop body
LE: loop exit
PB: predicated region body
PF: predicated region fallthrough
CT: control target
= control target key end

     0   :  { %9 = vsyncpa [#allocation3], 0  ;;  %s866_s15 = smov [#allocation2]   ;;  %s1023_s0 = inlined_call_operand.vmem [shape: bf16[16,32], index: 0, kind: input, shape index: {}]   ;;  %s1024_s1 = inlined_call_operand.vmem [shape: bf16[32,32], index: 1, kind: input, shape index: {}]   ;;  %s1025_s2 = inlined_call_operand.hbm [shape: bf16[6,32,32], index: 2, kind: input, shape index: {}]   ;;  %s1026_s3 = inlined_call_operand.vmem [shape: f32[16,32], index: 3, kind: input, shape index: {}]   ;;  %s1027_s4 = inlined_call_operand.vmem [shape: f32[3,16,32], index: 4, kind: output, shape index: {}]  }
   0x1   :  { %s19_s16 = sshll.u32 %s866_s15, 4  ;;  %s842_s19 = scalar_lea.hbm %s1025_s2, 1536  ;;  %s20_s16 = int_to_ptr.vmem [resolvable:$true] %s19_s16 }
   0x2   :  { %p843_p0 = scmp.ne.s32.totalorder %s1025_s2, %s842_s19  ;;  %p846_p1 = scmp.lt.u32.totalorder %s842_s19, %s1025_s2 }
   0x4   :  { %p848_p2 = pnand %p846_p1, %p843_p0 }
   0x6   :  { %851 = shalt.err (!%p848_p2)
}
   0x7   :  { %s852_s24 = scalar_lea.vmem %s20_s16, 1536  ;;  %p857_p4 = scmp.lt.s32.totalorder %s20_s16, %s20_s16 }
   0x8   :  { %p853_p3 = scmp.ne.s32.totalorder %s20_s16, %s852_s24  ;;  %p858_p5 = scmp.lt.s32.totalorder %s852_s24, %s852_s24 }
   0xa   :  { %p859_p6 = por %p858_p5, %p857_p4 }
   0xc   :  { %p860_p7 = pnand %p859_p6, %p853_p3 }
   0xe   :  { %863 = shalt.err (!%p860_p7)
}
   0xf   :  { %s867_s25 = smov 64   ;;  %s868_s26 = smov 4  }
  0x10   :  { %25 = dma.hbm_to_vmem [thread:$0]  %s1025_s2, 1536, %s20_s16, [#allocation3], %s867_s25, %s867_s25, %s868_s26  }
  0x11   :  { %864 = dma.done.wait [#allocation3], 1536  }
  0x12   :  { %865 = vsyncadd [#allocation3], 4294965760  ;;  %v869_v0 = vmov 0.0   ;;  %vm870_vm0 = vmmov 0   ;;  %v799_v1 = vld [vmem:[%s1024_s1] sm:$0xff]   ;;  %v800_v2 = vld [vmem:[%s1024_s1 + $0x8] sm:$0xff]  }
  0x13   :  { %738 = vmatprep.subr.bf16.mxu0 %v869_v0  ;;  %742 = vmatprep.mubr.msk.bf16.mxu0 %vm870_vm0, %v869_v0  ;;  %v801_v3 = vld [vmem:[%s1023_s0] sm:$0xff]   ;;  %vm60_vm1 = vcmask 261120   ;;  %v803_v24 = vld [vmem:[#allocation2 + $0x8] sm:$0xff]  }
  0x14   :  { %746 = vmatprep.subr.bf16.mxu1 %v869_v0  ;;  %750 = vmatprep.mubr.msk.bf16.mxu1 %vm870_vm0, %v869_v0  ;;  %v676_v4 = vld [vmem:[%s1026_s3] ss:$0 sm:$0xff]  ;;  %v681_v32 = vld [vmem:[%s1026_s3 + $0x1] ss:$0 sm:$0xff]  ;;  %v682_v34 = vld [vmem:[%s1026_s3 + $0x2] ss:$0 sm:$0xff] }
  0x15   :  { %739 = vmatpush3.bf16.msra.mxu0 %v799_v1  ;;  %v802_v23 = vld [vmem:[#allocation2] sm:$0xff]  }
  0x16   :  { %740 = vmatprep.subr.bf16.mxu0 %v869_v0  ;;  %747 = vmatpush3.bf16.msra.mxu1 %v802_v23  ;;  %v683_v60 = vld [vmem:[%s1026_s3 + $0x3] ss:$0 sm:$0xff] }
  0x17   :  { %748 = vmatprep.subr.bf16.mxu1 %v869_v0 }
  0x19   :  { %741 = vmatpush3.bf16.msra.mxu0 %v800_v2 }
  0x1a   :  { %754 = vmatprep.subr.bf16.mxu0 %v869_v0  ;;  %749 = vmatpush3.bf16.msra.mxu1 %v803_v24 }
  0x1b   :  { %762 = vmatprep.subr.bf16.mxu1 %v869_v0 }
  0x1c   :  { %743 = vmatmul.mubr.msk.bf16.vlgmr.msra.gmra.mrb[0].mxu0 %vm60_vm1, %v801_v3 }
  0x1d   :  { %758 = vmatprep.mubr.msk.bf16.mxu0 %vm870_vm0, %v869_v0 }
  0xef   :  { %v98_v5 = vpop.f32.mrb[0].mxu0 }
  0xf0   :  { %v99_v6 = vadd.f32 %v676_v4, %v98_v5  ;;  %v744_v7 = vpop.f32.mrb[1].mxu0 }
  0xf1   :  { %v101_v8 = vpop.f32.mrb[2].mxu0 }
  0xf2   :  { %v102_v9 = vadd.f32 %v676_v4, %v101_v8  ;;  %v745_v10 = vpop.f32.mrb[3].mxu0  ;;  %v107_v11 = vsel %vm60_vm1, %v99_v6, 0.0 }
  0xf3   :  { %108 = vadd.xlane.f32.xlu0 %v107_v11 }
  0xf4   :  { %v110_v12 = vsel %vm60_vm1, %v102_v9, 0.0 }
  0xf7   :  { %111 = vadd.xlane.f32.xlu0 %v110_v12 }
 0x180   :  { %v109_v13 = vpop.xlane.xlu0 %108 }
 0x181   :  { %v114_v14 = vmul.f32 0.03125, %v109_v13 }
 0x183   :  { %v116_v15 = vsub.f32 %v99_v6, %v114_v14 }
 0x184   :  { %v112_v16 = vpop.xlane.xlu0 %111 }
 0x185   :  { %v115_v17 = vmul.f32 0.03125, %v112_v16  ;;  %v118_v18 = vmul.f32 %v116_v15, %v116_v15  ;;  %v804_v16 = vld [vmem:[#allocation2 + $0x10] sm:$0xff]  }
 0x186   :  { %755 = vmatpush3.bf16.msra.mxu0 %v804_v16 }
 0x187   :  { %v117_v19 = vsub.f32 %v102_v9, %v115_v17  ;;  %v120_v20 = vsel %vm60_vm1, %v118_v18, 0.0  ;;  %756 = vmatprep.subr.bf16.mxu0 %v869_v0  ;;  %v805_v17 = vld [vmem:[#allocation2 + $0x18] sm:$0xff]  }
 0x188   :  { %121 = vadd.xlane.f32.xlu1 %v120_v20 }
 0x189   :  { %v119_v21 = vmul.f32 %v117_v19, %v117_v19 }
 0x18a   :  { %757 = vmatpush3.bf16.msra.mxu0 %v805_v17 }
 0x18b   :  { %v123_v22 = vsel %vm60_vm1, %v119_v21, 0.0  ;;  %770 = vmatprep.subr.bf16.mxu0 %v869_v0 }
 0x18c   :  { %124 = vadd.xlane.f32.xlu1 %v123_v22 }
 0x215   :  { %v122_v25 = vpop.xlane.xlu1 %121 }
 0x216   :  { %v126_v26 = vmul.f32 0.03125, %v122_v25  ;;  %v687_v25 = vld [vmem:[%s1026_s3 + $0x4] ss:$0 sm:$0xff] }
 0x218   :  { %v128_v27 = vadd.f32 1e-05, %v126_v26 }
 0x219   :  { %v125_v28 = vpop.xlane.xlu1 %124 }
 0x21a   :  { %814 = vrsqrt.f32 %v128_v27  ;;  %v127_v29 = vmul.f32 0.03125, %v125_v28 }
 0x21c   :  { %v129_v30 = vadd.f32 1e-05, %v127_v29 }
 0x21e   :  { %816 = vrsqrt.f32 %v129_v30  ;;  %v688_v30 = vld [vmem:[%s1026_s3 + $0x5] ss:$0 sm:$0xff] }
 0x224   :  { %v815_v31 = vpop.eup %814 }
 0x225   :  { %v132_v33 = vmul.f32 %v815_v31, %v116_v15 }
 0x227   :  { %v138_v35 = vmul.f32 %v681_v32, %v132_v33 }
 0x228   :  { %v817_v36 = vpop.eup %816 }
 0x229   :  { %v144_v37 = vadd.f32 %v682_v34, %v138_v35  ;;  %v133_v38 = vmul.f32 %v817_v36, %v117_v19  ;;  %v806_v35 = vld [vmem:[#allocation2 + $0x20] sm:$0xff]   ;;  %v807_v36 = vld [vmem:[#allocation2 + $0x28] sm:$0xff]  }
 0x22b   :  { %v139_v39 = vmul.f32 %v681_v32, %v133_v38  ;;  %v146_v40 = vmul.f32 %v144_v37, %v144_v37 }
 0x22d   :  { %v145_v41 = vadd.f32 %v682_v34, %v139_v39  ;;  %v148_v42 = vmul.f32 %v146_v40, %v144_v37 }
 0x22f   :  { %v147_v43 = vmul.f32 %v145_v41, %v145_v41  ;;  %v150_v44 = vmul.f32 0.044715, %v148_v42 }
 0x231   :  { %v149_v45 = vmul.f32 %v147_v43, %v145_v41  ;;  %v152_v46 = vadd.f32 %v150_v44, %v144_v37 }
 0x233   :  { %v151_v47 = vmul.f32 0.044715, %v149_v45  ;;  %v154_v48 = vmul.f32 0.7978846, %v152_v46 }
 0x235   :  { %v153_v49 = vadd.f32 %v151_v47, %v145_v41  ;;  %818 = vtanh.f32 %v154_v48 }
 0x237   :  { %v155_v50 = vmul.f32 0.7978846, %v153_v49 }
 0x239   :  { %820 = vtanh.f32 %v155_v50 }
 0x23f   :  { %v819_v51 = vpop.eup %818 }
 0x240   :  { %v158_v52 = vadd.f32 1.0, %v819_v51 }
 0x242   :  { %v160_v55 = vmul.f32 0.5, %v158_v52 }
 0x243   :  { %v821_v53 = vpop.eup %820 }
 0x244   :  { %v159_v54 = vadd.f32 1.0, %v821_v53  ;;  %v162_v57 = vmul.f32 %v160_v55, %v144_v37  ;;  %v689_v37 = vld [vmem:[%s1026_s3 + $0x6] ss:$0 sm:$0xff] }
 0x246   :  { %v161_v56 = vmul.f32 0.5, %v159_v54 }
 0x248   :  { %v163_v58 = vmul.f32 %v161_v56, %v145_v41 }
 0x24a   :  { %v164_v59 = vpack.c.bf16 %v163_v58, %v162_v57 }
 0x24c   :  { %751 = vmatmul.mubr.msk.bf16.vlgmr.msra.gmra.mrb[0].mxu1 %vm60_vm1, %v164_v59 }
 0x24d   :  { %766 = vmatprep.mubr.msk.bf16.mxu1 %vm870_vm0, %v869_v0  ;;  %763 = vmatpush3.bf16.msra.mxu1 %v806_v35 }
 0x24e   :  { %764 = vmatprep.subr.bf16.mxu1 %v869_v0 }
 0x251   :  { %765 = vmatpush3.bf16.msra.mxu1 %v807_v36 }
 0x252   :  { %778 = vmatprep.subr.bf16.mxu1 %v869_v0 }
 0x31f   :  { %v223_v61 = vpop.f32.mrb[0].mxu1 }
 0x320   :  { %v224_v62 = vadd.f32 %v683_v60, %v223_v61  ;;  %v752_v63 = vpop.f32.mrb[1].mxu1 }
 0x321   :  { %v226_v1 = vpop.f32.mrb[2].mxu1 }
 0x322   :  { %v227_v2 = vadd.f32 %v683_v60, %v226_v1  ;;  %v753_v3 = vpop.f32.mrb[3].mxu1  ;;  %v232_v4 = vsel %vm60_vm1, %v224_v62, 0.0  ;;  %v809_v1 = vld [vmem:[#allocation2 + $0x30] sm:$0xff]  }
 0x323   :  { %233 = vadd.xlane.f32.xlu0 %v232_v4  ;;  %v811_v3 = vld [vmem:[#allocation2 + $0x38] sm:$0xff]   ;;  %v693_v4 = vld [vmem:[%s1026_s3 + $0x7] ss:$0 sm:$0xff] }
 0x324   :  { %v235_v5 = vsel %vm60_vm1, %v227_v2, 0.0 }
 0x325   :  { %236 = vadd.xlane.f32.xlu1 %v235_v5 }
 0x3b0   :  { %v234_v6 = vpop.xlane.xlu0 %233 }
 0x3b1   :  { %v238_v7 = vmul.f32 0.03125, %v234_v6 }
 0x3b2   :  { %v237_v8 = vpop.xlane.xlu1 %236 }
 0x3b3   :  { %v240_v9 = vsub.f32 %v224_v62, %v238_v7  ;;  %v239_v10 = vmul.f32 0.03125, %v237_v8  ;;  %v808_v62 = vld [vmem:[#allocation2 + $0x40] sm:$0xff]  }
 0x3b5   :  { %v241_v11 = vsub.f32 %v227_v2, %v239_v10  ;;  %v242_v12 = vmul.f32 %v240_v9, %v240_v9  ;;  %v810_v2 = vld [vmem:[#allocation2 + $0x48] sm:$0xff]  }
 0x3b7   :  { %v244_v13 = vsel %vm60_vm1, %v242_v12, 0.0  ;;  %v243_v14 = vmul.f32 %v241_v11, %v241_v11  ;;  %v812_v12 = vld [vmem:[#allocation2 + $0x50] sm:$0xff]  }
 0x3b8   :  { %245 = vadd.xlane.f32.xlu0 %v244_v13  ;;  %v813_v13 = vld [vmem:[#allocation2 + $0x58] sm:$0xff]  }
 0x3b9   :  { %v247_v15 = vsel %vm60_vm1, %v243_v14, 0.0  ;;  %v697_v14 = vld [vmem:[%s1026_s3 + $0x8] ss:$0 sm:$0xff] }
 0x3ba   :  { %248 = vadd.xlane.f32.xlu1 %v247_v15  ;;  %v705_v15 = vld [vmem:[%s1026_s3 + $0x9] ss:$0 sm:$0xff] }
 0x445   :  { %v246_v18 = vpop.xlane.xlu0 %245 }
 0x446   :  { %v250_v19 = vmul.f32 0.03125, %v246_v18 }
 0x447   :  { %v249_v20 = vpop.xlane.xlu1 %248 }
 0x448   :  { %v252_v21 = vadd.f32 1e-05, %v250_v19  ;;  %v251_v22 = vmul.f32 0.03125, %v249_v20 }
 0x44a   :  { %822 = vrsqrt.f32 %v252_v21  ;;  %v253_v23 = vadd.f32 1e-05, %v251_v22 }
 0x44c   :  { %824 = vrsqrt.f32 %v253_v23 }
 0x454   :  { %v823_v24 = vpop.eup %822 }
 0x455   :  { %v256_v26 = vmul.f32 %v823_v24, %v240_v9 }
 0x456   :  { %v825_v27 = vpop.eup %824 }
 0x457   :  { %v262_v28 = vmul.f32 %v687_v25, %v256_v26  ;;  %v257_v29 = vmul.f32 %v825_v27, %v241_v11 }
 0x459   :  { %v263_v31 = vmul.f32 %v687_v25, %v257_v29  ;;  %v268_v32 = vadd.f32 %v688_v30, %v262_v28 }
 0x45b   :  { %v269_v33 = vadd.f32 %v688_v30, %v263_v31 }
 0x45d   :  { %v270_v34 = vpack.c.bf16 %v269_v33, %v268_v32 }
 0x45f   :  { %759 = vmatmul.mubr.msk.bf16.vlgmr.msra.gmra.mrb[4].mxu0 %vm60_vm1, %v270_v34 }
 0x460   :  { %774 = vmatprep.mubr.msk.bf16.mxu0 %vm870_vm0, %v869_v0  ;;  %771 = vmatpush3.bf16.msra.mxu0 %v809_v1 }
 0x461   :  { %772 = vmatprep.subr.bf16.mxu0 %v869_v0 }
 0x464   :  { %773 = vmatpush3.bf16.msra.mxu0 %v811_v3 }
 0x465   :  { %786 = vmatprep.subr.bf16.mxu0 %v869_v0 }
 0x532   :  { %v330_v38 = vpop.f32.mrb[4].mxu0 }
 0x533   :  { %v331_v39 = vadd.f32 %v689_v37, %v330_v38  ;;  %v760_v40 = vpop.f32.mrb[5].mxu0 }
 0x534   :  { %v333_v41 = vpop.f32.mrb[6].mxu0 }
 0x535   :  { %v337_v42 = vmul.f32 %v331_v39, %v331_v39  ;;  %v334_v43 = vadd.f32 %v689_v37, %v333_v41  ;;  %v761_v44 = vpop.f32.mrb[7].mxu0 }
 0x537   :  { %v339_v45 = vmul.f32 %v337_v42, %v331_v39  ;;  %v338_v46 = vmul.f32 %v334_v43, %v334_v43 }
 0x539   :  { %v341_v47 = vmul.f32 0.044715, %v339_v45  ;;  %v340_v48 = vmul.f32 %v338_v46, %v334_v43  ;;  %v703_v46 = vld [vmem:[%s1026_s3 + $0xc] ss:$0 sm:$0xff] }
 0x53b   :  { %v343_v49 = vadd.f32 %v341_v47, %v331_v39  ;;  %v342_v50 = vmul.f32 0.044715, %v340_v48 }
 0x53d   :  { %v345_v51 = vmul.f32 0.7978846, %v343_v49  ;;  %v344_v52 = vadd.f32 %v342_v50, %v334_v43  ;;  %v704_v50 = vld [vmem:[%s1026_s3 + $0xb] ss:$0 sm:$0xff] }
 0x53f   :  { %826 = vtanh.f32 %v345_v51  ;;  %v346_v53 = vmul.f32 0.7978846, %v344_v52 }
 0x541   :  { %828 = vtanh.f32 %v346_v53 }
 0x549   :  { %v827_v54 = vpop.eup %826 }
 0x54a   :  { %v349_v55 = vadd.f32 1.0, %v827_v54 }
 0x54b   :  { %v829_v56 = vpop.eup %828 }
 0x54c   :  { %v351_v57 = vmul.f32 0.5, %v349_v55  ;;  %v350_v58 = vadd.f32 1.0, %v829_v56 }
 0x54e   :  { %v352_v59 = vmul.f32 0.5, %v350_v58  ;;  %v353_v60 = vmul.f32 %v351_v57, %v331_v39 }
 0x550   :  { %v354_v61 = vmul.f32 %v352_v59, %v334_v43 }
 0x552   :  { %v355_v63 = vpack.c.bf16 %v354_v61, %v353_v60  ;;  %v709_v60 = vld [vmem:[%s1026_s3 + $0xa] ss:$0 sm:$0xff] }
 0x554   :  { %767 = vmatmul.mubr.msk.bf16.vlgmr.msra.gmra.mrb[4].mxu1 %vm60_vm1, %v355_v63 }
 0x555   :  { %779 = vmatpush3.bf16.msra.mxu1 %v808_v62  ;;  %782 = vmatprep.mubr.msk.bf16.mxu1 %vm870_vm0, %v869_v0 }
 0x556   :  { %780 = vmatprep.subr.bf16.mxu1 %v869_v0 }
 0x559   :  { %781 = vmatpush3.bf16.msra.mxu1 %v810_v2 }
 0x627   :  { %v415_v5 = vpop.f32.mrb[4].mxu1 }
 0x628   :  { %v416_v6 = vadd.f32 %v693_v4, %v415_v5  ;;  %v768_v7 = vpop.f32.mrb[5].mxu1 }
 0x629   :  { %v418_v8 = vpop.f32.mrb[6].mxu1 }
 0x62a   :  { %663 = vst.msk [vmem:[%s1027_s4] sm:$0xff] %vm60_vm1, %v416_v6  ;;  %v419_v9 = vadd.f32 %v693_v4, %v418_v8  ;;  %v769_v10 = vpop.f32.mrb[7].mxu1 }
 0x62c   :  { %v422_v11 = vpack.c.bf16 %v419_v9, %v416_v6  ;;  %664 = vst.msk [vmem:[%s1027_s4 + $0x8] sm:$0xff] %vm60_vm1, %v419_v9 }
 0x62e   :  { %775 = vmatmul.mubr.msk.bf16.vlgmr.msra.gmra.mrb[8].mxu0 %vm60_vm1, %v422_v11  ;;  %783 = vmatmul.mubr.msk.bf16.vlgmr.msra.gmra.mrb[8].mxu1 %vm60_vm1, %v422_v11 }
 0x62f   :  { %790 = vmatprep.mubr.msk.bf16.mxu0 %vm870_vm0, %v869_v0  ;;  %787 = vmatpush3.bf16.msra.mxu0 %v812_v12 }
 0x630   :  { %788 = vmatprep.subr.bf16.mxu0 %v869_v0 }
 0x633   :  { %789 = vmatpush3.bf16.msra.mxu0 %v813_v13 }
 0x701   :  { %v482_v16 = vpop.f32.mrb[8].mxu0  ;;  %v571_v17 = vpop.f32.mrb[8].mxu1 }
 0x702   :  { %v483_v18 = vadd.f32 %v697_v14, %v482_v16  ;;  %v572_v19 = vadd.f32 %v705_v15, %v571_v17  ;;  %v776_v20 = vpop.f32.mrb[9].mxu0  ;;  %v784_v21 = vpop.f32.mrb[9].mxu1 }
 0x703   :  { %v485_v22 = vpop.f32.mrb[10].mxu0  ;;  %v574_v23 = vpop.f32.mrb[10].mxu1 }
 0x704   :  { %v701_v24 = vmul.f32 -1.442695, %v483_v18  ;;  %v578_v0 = vmul.f32 %v572_v19, %v572_v19  ;;  %v486_v25 = vadd.f32 %v697_v14, %v485_v22  ;;  %v575_v26 = vadd.f32 %v705_v15, %v574_v23  ;;  %v777_v27 = vpop.f32.mrb[11].mxu0  ;;  %v785_v28 = vpop.f32.mrb[11].mxu1 }
 0x706   :  { %830 = vpow2.f32 %v701_v24  ;;  %v580_v29 = vmul.f32 %v578_v0, %v572_v19  ;;  %v702_v30 = vmul.f32 -1.442695, %v486_v25  ;;  %v579_v31 = vmul.f32 %v575_v26, %v575_v26 }
 0x708   :  { %v582_v32 = vmul.f32 0.044715, %v580_v29  ;;  %832 = vpow2.f32 %v702_v30  ;;  %v581_v33 = vmul.f32 %v579_v31, %v575_v26 }
 0x70a   :  { %v584_v34 = vadd.f32 %v582_v32, %v572_v19  ;;  %v583_v35 = vmul.f32 0.044715, %v581_v33 }
 0x70c   :  { %v586_v36 = vmul.f32 0.7978846, %v584_v34  ;;  %v585_v37 = vadd.f32 %v583_v35, %v575_v26 }
 0x70e   :  { %834 = vtanh.f32 %v586_v36  ;;  %v587_v38 = vmul.f32 0.7978846, %v585_v37 }
 0x710   :  { %v831_v39 = vpop.eup %830  ;;  %836 = vtanh.f32 %v587_v38 }
 0x711   :  { %v495_v40 = vadd.f32 1.0, %v831_v39 }
 0x712   :  { %v833_v41 = vpop.eup %832 }
 0x713   :  { %838 = vrcp.f32 %v495_v40  ;;  %v496_v42 = vadd.f32 1.0, %v833_v41 }
 0x715   :  { %840 = vrcp.f32 %v496_v42 }
 0x718   :  { %v835_v43 = vpop.eup %834 }
 0x719   :  { %v590_v44 = vadd.f32 1.0, %v835_v43 }
 0x71a   :  { %v837_v45 = vpop.eup %836 }
 0x71b   :  { %v592_v47 = vmul.f32 0.5, %v590_v44  ;;  %v591_v48 = vadd.f32 1.0, %v837_v45 }
 0x71d   :  { %v839_v49 = vpop.eup %838  ;;  %v593_v51 = vmul.f32 0.5, %v591_v48  ;;  %v594_v54 = vmul.f32 %v592_v47, %v572_v19 }
 0x71e   :  { %v507_v52 = vmul.f32 %v839_v49, %v703_v46 }
 0x71f   :  { %v841_v53 = vpop.eup %840  ;;  %v595_v55 = vmul.f32 %v593_v51, %v575_v26 }
 0x720   :  { %v513_v56 = vadd.f32 %v704_v50, %v507_v52  ;;  %v508_v57 = vmul.f32 %v841_v53, %v703_v46 }
 0x721   :  { %v596_v58 = vpack.c.bf16 %v595_v55, %v594_v54 }
 0x722   :  { %715 = vst.msk [vmem:[%s1027_s4 + $0x20] sm:$0xff] %vm60_vm1, %v513_v56  ;;  %v514_v59 = vadd.f32 %v704_v50, %v508_v57 }
 0x723   :  { %791 = vmatmul.mubr.msk.bf16.vlgmr.msra.gmra.mrb[12].mxu0 %vm60_vm1, %v596_v58 }
 0x724   :  { %716 = vst.msk [vmem:[%s1027_s4 + $0x28] sm:$0xff] %vm60_vm1, %v514_v59 }
 0x7f6   :  { %v656_v61 = vpop.f32.mrb[12].mxu0 }
 0x7f7   :  { %v657_v62 = vadd.f32 %v709_v60, %v656_v61  ;;  %v792_v63 = vpop.f32.mrb[13].mxu0 }
 0x7f8   :  { %v659_v1 = vpop.f32.mrb[14].mxu0 }
 0x7f9   :  { %713 = vst.msk [vmem:[%s1027_s4 + $0x10] sm:$0xff] %vm60_vm1, %v657_v62  ;;  %v660_v2 = vadd.f32 %v709_v60, %v659_v1  ;;  %v793_v3 = vpop.f32.mrb[15].mxu0 }
 0x7fb   :  { %714 = vst.msk [vmem:[%s1027_s4 + $0x18] sm:$0xff] %vm60_vm1, %v660_v2 }
 0x7fc   :  { %675 = vsyncpa [#allocation3], 1 }

</bundles_post_ra>
